<compile_context>
chip_gen: v7x
topology: tpu7x:2x2x1
jax: 0.10.0
libtpu: 0.0.40
codegen_flags: <defaults>
</compile_context>

<pallas_src>
import functools
import math

import jax
import jax.numpy as jnp
from jax.experimental import pallas as pl
from jax.experimental.pallas import tpu as pltpu


def _sdpa_kernel(q_ref, k_ref, v_ref, *refs, inv_temper, mxu_dtype, emit_attn):
    if emit_attn:
        out_ref, attn_ref, acc_ref = refs
    else:
        out_ref, acc_ref = refs
        attn_ref = None

    kt = pl.program_id(1)

    @pl.when(kt == 0)
    def _():
        acc_ref[...] = jnp.zeros_like(acc_ref)

    # Fold the 1/sqrt(dim_model) scale into q (Lq*D mults, not Lq*Lk).
    q = q_ref[...] * inv_temper          # (BB, Lq, D)
    k = k_ref[...]                        # (BB, TK, D)
    v = v_ref[...]                        # (BB, TK, Dv)
    if mxu_dtype is not None:
        q = q.astype(mxu_dtype)
        k = k.astype(mxu_dtype)

    # scores = q @ k^T: contract the last dims directly — no XLU transpose of k.
    s = jax.lax.dot_general(
        q, k,
        dimension_numbers=(((2,), (2,)), ((0,), (0,))),
        preferred_element_type=jnp.float32,
    )                                     # (BB, Lq, TK) f32

    # Softmax over the *query* axis (dim=1 of (B, Lq, Lk)) — faithful to the
    # PyTorch module's nn.Softmax(dim=1).  Each key column is independent, so
    # key tiles need no cross-tile (online) pass.
    m = jnp.max(s, axis=1, keepdims=True)
    e = jnp.exp(s - m)
    denom = jnp.sum(e, axis=1, keepdims=True)
    attn = e * pl.reciprocal(denom, approx=True)   # EUP slot, ~free vs. VPU

    if attn_ref is not None:
        attn_ref[...] = attn.astype(attn_ref.dtype)

    a = attn
    if mxu_dtype is not None:
        a = a.astype(mxu_dtype)
        v = v.astype(mxu_dtype)
    acc_ref[...] += jax.lax.dot_general(
        a, v,
        dimension_numbers=(((2,), (1,)), ((0,), (0,))),
        preferred_element_type=jnp.float32,
    )                                     # (BB, Lq, Dv)

    @pl.when(kt == pl.num_programs(1) - 1)
    def _():
        out_ref[...] = acc_ref[...].astype(out_ref.dtype)


def _pick_block_k(Lk):
    if Lk <= 512:
        return Lk                          # full-extent block (no tiling needed)
    for cand in (512, 384, 256, 128):
        if Lk % cand == 0:
            return cand
    return Lk


def scaled_dot_product_attention(q, k, v, dim_model, *, block_b=None,
                                 block_k=None, mxu_dtype=None,
                                 attn_dtype=None, return_attention=True):
    """Matches the PyTorch module in eval mode.

    Returns (output, attention) if `return_attention` else just output.
    """
    B, Lq, D = q.shape
    Bk, Lk, Dk = k.shape
    Bv, Lkv, Dv = v.shape
    assert B == Bk == Bv and Lk == Lkv and Dk == D

    inv_temper = 1.0 / math.sqrt(dim_model)

    if block_b is None:
        block_b = B if B <= 8 else 1       # amortize per-step overhead for tiny B
    assert B % block_b == 0, "block_b must divide the batch"
    if block_k is None:
        block_k = _pick_block_k(Lk)
    assert Lk % block_k == 0, "block_k must divide Lk"
    if block_k != Lk:
        assert block_k % 128 == 0, "tiled key blocks must be lane-aligned (128)"

    n_b = B // block_b
    n_k = Lk // block_k
    attn_dtype = attn_dtype or q.dtype

    kernel = functools.partial(_sdpa_kernel, inv_temper=inv_temper,
                               mxu_dtype=mxu_dtype,
                               emit_attn=return_attention)

    in_specs = [
        pl.BlockSpec((block_b, Lq, D), lambda b, kt: (b, 0, 0)),
        pl.BlockSpec((block_b, block_k, D), lambda b, kt: (b, kt, 0)),
        pl.BlockSpec((block_b, block_k, Dv), lambda b, kt: (b, kt, 0)),
    ]
    # Output block stays at (b, 0, 0) across the key axis -> VMEM-resident
    # accumulator, one HBM writeback at the end of the key reduction.
    out_spec_o = pl.BlockSpec((block_b, Lq, Dv), lambda b, kt: (b, 0, 0))
    out_spec_a = pl.BlockSpec((block_b, Lq, block_k), lambda b, kt: (b, 0, kt))

    if return_attention:
        out_shape = (jax.ShapeDtypeStruct((B, Lq, Dv), q.dtype),
                     jax.ShapeDtypeStruct((B, Lq, Lk), attn_dtype))
        out_specs = [out_spec_o, out_spec_a]
    else:
        out_shape = jax.ShapeDtypeStruct((B, Lq, Dv), q.dtype)
        out_specs = out_spec_o

    grid_spec = pltpu.PrefetchScalarGridSpec(
        num_scalar_prefetch=0,
        grid=(n_b, n_k),                   # key (reduction) axis last
        in_specs=in_specs,
        out_specs=out_specs,
        scratch_shapes=[pltpu.VMEM((block_b, Lq, Dv), jnp.float32)],
    )

    # Rough per-step VMEM footprint (double-buffered pipeline blocks + scratch);
    # sets an explicit scoped-VMEM limit, capped at 64 MiB (v7x physical).
    itm = q.dtype.itemsize
    step_bytes = 2 * (block_b * Lq * D * itm
                      + block_b * block_k * (D + Dv) * itm
                      + block_b * Lq * Dv * itm
                      + (block_b * Lq * block_k * jnp.dtype(attn_dtype).itemsize
                         if return_attention else 0))
    step_bytes += block_b * Lq * Dv * 4
    vmem_limit = int(min(64 * 2**20, max(32 * 2**20, 4 * step_bytes)))

    return pl.pallas_call(
        kernel,
        out_shape=out_shape,
        grid_spec=grid_spec,
        compiler_params=pltpu.CompilerParams(
            dimension_semantics=("parallel", "arbitrary"),
            vmem_limit_bytes=vmem_limit,
        ),
    )(q, k, v)


def _reference(q, k, v, dim_model):
    temper = math.sqrt(dim_model)
    s = jnp.einsum("bqd,bkd->bqk", q, k) / temper
    attn = jax.nn.softmax(s, axis=1)  # dim=1, as in the PyTorch module
    out = jnp.einsum("bqk,bkd->bqd", attn, v)
    return out, attn


if __name__ == "__main__":
    # --- Case 1: the shipped tiny shapes (B=2, L=8, D=32). ---
    # One grid step covers all batches (block_b=B) and the whole key extent.
    B, L, D = 2, 8, 32
    kq, kk, kv = jax.random.split(jax.random.PRNGKey(0), 3)
    q = jax.random.normal(kq, (B, L, D), dtype=jnp.float32)
    k = jax.random.normal(kk, (B, L, D), dtype=jnp.float32)
    v = jax.random.normal(kv, (B, L, D), dtype=jnp.float32)

    out, attn = scaled_dot_product_attention(q, k, v, dim_model=D)
    jax.block_until_ready((out, attn))
    ref_out, ref_attn = _reference(q, k, v, dim_model=D)
    # Tolerances loosened slightly for the approximate (EUP) reciprocal.
    assert jnp.allclose(out, ref_out, atol=2e-3, rtol=2e-2)
    assert jnp.allclose(attn, ref_attn, atol=1e-4, rtol=2e-2)

    # Output-only variant: skips the O(L^2) attention-probabilities writeback.
    out_only = scaled_dot_product_attention(q, k, v, dim_model=D,
                                            return_attention=False)
    jax.block_until_ready(out_only)
    assert jnp.allclose(out_only, ref_out, atol=2e-3, rtol=2e-2)

    # --- Case 2: exercise the key-tiled path (grid=(B, Lk//128)) with the
    # VMEM-resident output accumulator. ---
    B2, L2, D2 = 2, 256, 128
    kq2, kk2, kv2 = jax.random.split(jax.random.PRNGKey(1), 3)
    q2 = jax.random.normal(kq2, (B2, L2, D2), dtype=jnp.float32)
    k2 = jax.random.normal(kk2, (B2, L2, D2), dtype=jnp.float32)
    v2 = jax.random.normal(kv2, (B2, L2, D2), dtype=jnp.float32)
    out2, attn2 = scaled_dot_product_attention(q2, k2, v2, dim_model=D2,
                                               block_b=1, block_k=128)
    jax.block_until_ready((out2, attn2))
    ref_out2, ref_attn2 = _reference(q2, k2, v2, dim_model=D2)
    assert jnp.allclose(out2, ref_out2, atol=2e-3, rtol=2e-2)
    assert jnp.allclose(attn2, ref_attn2, atol=1e-4, rtol=2e-2)

    print("KERNEL_OK")
</pallas_src>

<mosaic_0001>
module attributes {stable_mosaic.version = 11 : i64} {
  func.func @_sdpa_kernel(%arg0: i32, %arg1: i32, %arg2: memref<2x8x32xf32, #tpu.memory_space<vmem>>, %arg3: memref<2x8x32xf32, #tpu.memory_space<vmem>>, %arg4: memref<2x8x32xf32, #tpu.memory_space<vmem>>, %arg5: memref<2x8x32xf32, #tpu.memory_space<vmem>>, %arg6: memref<2x8x8xf32, #tpu.memory_space<vmem>>, %arg7: memref<2x8x32xf32, #tpu.memory_space<vmem>>) attributes {dimension_semantics = [#tpu.dimension_semantics<parallel>, #tpu.dimension_semantics<arbitrary>], iteration_bounds = array<i64: 1, 1>, scalar_prefetch = 0 : i64, scratch_operands = 1 : i64, tpu.core_type = #tpu.core_type<tc>, window_params = [{transform_indices = @transform_0, window_bounds = array<i64: 2, 8, 32>}, {transform_indices = @transform_1, window_bounds = array<i64: 2, 8, 32>}, {transform_indices = @transform_2, window_bounds = array<i64: 2, 8, 32>}, {transform_indices = @transform_3, window_bounds = array<i64: 2, 8, 32>}, {transform_indices = @transform_4, window_bounds = array<i64: 2, 8, 8>}]} {
    %c0_i32 = arith.constant 0 : i32
    %0 = arith.cmpi eq, %arg1, %c0_i32 : i32
    %1 = arith.extui %0 : i1 to i32
    %c0_i32_0 = arith.constant 0 : i32
    %2 = arith.cmpi ne, %1, %c0_i32_0 : i32
    scf.if %2 {
      %cst_24 = arith.constant 0.000000e+00 : f32
      %27 = vector.broadcast %cst_24 : f32 to vector<2x8x32xf32>
      %c0_25 = arith.constant 0 : index
      %c0_26 = arith.constant 0 : index
      %c0_27 = arith.constant 0 : index
      %28 = vector.load %arg7[%c0_25, %c0_26, %c0_27] : memref<2x8x32xf32, #tpu.memory_space<vmem>>, vector<2x8x32xf32>
      tpu.vector_store %arg7[%c0_25, %c0_26, %c0_27], %27 {strides = array<i32>} : memref<2x8x32xf32, #tpu.memory_space<vmem>>, vector<2x8x32xf32>,
    } else {
    }
    %c0 = arith.constant 0 : index
    %c0_1 = arith.constant 0 : index
    %c0_2 = arith.constant 0 : index
    %3 = vector.load %arg2[%c0, %c0_1, %c0_2] : memref<2x8x32xf32, #tpu.memory_space<vmem>>, vector<2x8x32xf32>
    %cst = arith.constant 0.176776692 : f32
    %4 = vector.broadcast %cst : f32 to vector<2x8x32xf32>
    %5 = arith.mulf %3, %4 : vector<2x8x32xf32>
    %c0_3 = arith.constant 0 : index
    %c0_4 = arith.constant 0 : index
    %c0_5 = arith.constant 0 : index
    %6 = vector.load %arg3[%c0_3, %c0_4, %c0_5] : memref<2x8x32xf32, #tpu.memory_space<vmem>>, vector<2x8x32xf32>
    %c0_6 = arith.constant 0 : index
    %c0_7 = arith.constant 0 : index
    %c0_8 = arith.constant 0 : index
    %7 = vector.load %arg4[%c0_6, %c0_7, %c0_8] : memref<2x8x32xf32, #tpu.memory_space<vmem>>, vector<2x8x32xf32>
    %cst_9 = arith.constant dense<0.000000e+00> : vector<2x8x8xf32>
    %8 = tpu.matmul %5, %6, %cst_9 {dimension_numbers = #tpu.dot_dimension_numbers<[2], [2], [1], [1], [0, 0, 0, 1, 1, 1], [0], [0]>} : vector<2x8x32xf32>, vector<2x8x32xf32>, vector<2x8x8xf32> -> vector<2x8x8xf32>
    %cst_10 = arith.constant dense<0xFF800000> : vector<2x8xf32>
    %9 = vector.multi_reduction <maximumf>, %8, %cst_10 [1] : vector<2x8x8xf32> to vector<2x8xf32>
    %10 = vector.shape_cast %9 : vector<2x8xf32> to vector<2x1x8xf32>
    %11 = vector.broadcast %10 : vector<2x1x8xf32> to vector<2x8x8xf32>
    %12 = arith.subf %8, %11 : vector<2x8x8xf32>
    %13 = math.exp %12 : vector<2x8x8xf32>
    %cst_11 = arith.constant dense<0.000000e+00> : vector<2x8xf32>
    %14 = vector.multi_reduction <add>, %13, %cst_11 [1] : vector<2x8x8xf32> to vector<2x8xf32>
    %15 = vector.shape_cast %14 : vector<2x8xf32> to vector<2x1x8xf32>
    %16 = tpu.reciprocal %15 {approx = true} : vector<2x1x8xf32> -> vector<2x1x8xf32>
    %17 = vector.broadcast %16 : vector<2x1x8xf32> to vector<2x8x8xf32>
    %18 = arith.mulf %13, %17 : vector<2x8x8xf32>
    %c0_12 = arith.constant 0 : index
    %c0_13 = arith.constant 0 : index
    %c0_14 = arith.constant 0 : index
    %19 = vector.load %arg6[%c0_12, %c0_13, %c0_14] : memref<2x8x8xf32, #tpu.memory_space<vmem>>, vector<2x8x8xf32>
    tpu.vector_store %arg6[%c0_12, %c0_13, %c0_14], %18 {strides = array<i32>} : memref<2x8x8xf32, #tpu.memory_space<vmem>>, vector<2x8x8xf32>,
    %c0_15 = arith.constant 0 : index
    %c0_16 = arith.constant 0 : index
    %c0_17 = arith.constant 0 : index
    %20 = vector.load %arg7[%c0_15, %c0_16, %c0_17] : memref<2x8x32xf32, #tpu.memory_space<vmem>>, vector<2x8x32xf32>
    %cst_18 = arith.constant dense<0.000000e+00> : vector<2x8x32xf32>
    %21 = tpu.matmul %18, %7, %cst_18 {dimension_numbers = #tpu.dot_dimension_numbers<[2], [1], [1], [2], [0, 0, 0, 1, 1, 2], [0], [0]>} : vector<2x8x8xf32>, vector<2x8x32xf32>, vector<2x8x32xf32> -> vector<2x8x32xf32>
    %22 = arith.addf %20, %21 : vector<2x8x32xf32>
    %c0_19 = arith.constant 0 : index
    %c0_20 = arith.constant 0 : index
    %c0_21 = arith.constant 0 : index
    %23 = vector.load %arg7[%c0_19, %c0_20, %c0_21] : memref<2x8x32xf32, #tpu.memory_space<vmem>>, vector<2x8x32xf32>
    tpu.vector_store %arg7[%c0_19, %c0_20, %c0_21], %22 {strides = array<i32>} : memref<2x8x32xf32, #tpu.memory_space<vmem>>, vector<2x8x32xf32>,
    %c0_i32_22 = arith.constant 0 : i32
    %24 = arith.cmpi eq, %arg1, %c0_i32_22 : i32
    %25 = arith.extui %24 : i1 to i32
    %c0_i32_23 = arith.constant 0 : i32
    %26 = arith.cmpi ne, %25, %c0_i32_23 : i32
    scf.if %26 {
      %c0_24 = arith.constant 0 : index
      %c0_25 = arith.constant 0 : index
      %c0_26 = arith.constant 0 : index
      %27 = vector.load %arg7[%c0_24, %c0_25, %c0_26] : memref<2x8x32xf32, #tpu.memory_space<vmem>>, vector<2x8x32xf32>
      %c0_27 = arith.constant 0 : index
      %c0_28 = arith.constant 0 : index
      %c0_29 = arith.constant 0 : index
      %28 = vector.load %arg5[%c0_27, %c0_28, %c0_29] : memref<2x8x32xf32, #tpu.memory_space<vmem>>, vector<2x8x32xf32>
      tpu.vector_store %arg5[%c0_27, %c0_28, %c0_29], %27 {strides = array<i32>} : memref<2x8x32xf32, #tpu.memory_space<vmem>>, vector<2x8x32xf32>,
    } else {
    }
    return
  }
  func.func @transform_0(%arg0: i32, %arg1: i32) -> (i32, i32, i32) {
    %c0_i32 = arith.constant 0 : i32
    %c0_i32_0 = arith.constant 0 : i32
    %c0_i32_1 = arith.constant 0 : i32
    return %arg0, %c0_i32, %c0_i32_0 : i32, i32, i32
  }
  func.func @transform_1(%arg0: i32, %arg1: i32) -> (i32, i32, i32) {
    %c0_i32 = arith.constant 0 : i32
    %c0_i32_0 = arith.constant 0 : i32
    return %arg0, %arg1, %c0_i32 : i32, i32, i32
  }
  func.func @transform_2(%arg0: i32, %arg1: i32) -> (i32, i32, i32) {
    %c0_i32 = arith.constant 0 : i32
    %c0_i32_0 = arith.constant 0 : i32
    return %arg0, %arg1, %c0_i32 : i32, i32, i32
  }
  func.func @transform_3(%arg0: i32, %arg1: i32) -> (i32, i32, i32) {
    %c0_i32 = arith.constant 0 : i32
    %c0_i32_0 = arith.constant 0 : i32
    %c0_i32_1 = arith.constant 0 : i32
    return %arg0, %c0_i32, %c0_i32_0 : i32, i32, i32
  }
  func.func @transform_4(%arg0: i32, %arg1: i32) -> (i32, i32, i32) {
    %c0_i32 = arith.constant 0 : i32
    %c0_i32_0 = arith.constant 0 : i32
    return %arg0, %c0_i32, %arg1 : i32, i32, i32
  }
}

</mosaic_0001>

<bundles_post_ra>
// kernel: tpu_custom_call.1
= control target key start
LH: loop header
LB: loop body
LE: loop exit
PB: predicated region body
PF: predicated region fallthrough
CT: control target
= control target key end

     0   :  { %10 = vsyncpa [#allocation4], 0  ;;  %s768_s0 = inlined_call_operand.hbm [shape: f32[2,8,32], index: 0, kind: input, shape index: {}]   ;;  %s769_s1 = inlined_call_operand.hbm [shape: f32[2,8,32], index: 1, kind: input, shape index: {}]   ;;  %s770_s2 = inlined_call_operand.hbm [shape: f32[2,8,32], index: 2, kind: input, shape index: {}]   ;;  %s771_s3 = inlined_call_operand.hbm [shape: f32[2,8,32], index: 3, kind: output, shape index: {0}]   ;;  %s772_s4 = inlined_call_operand.hbm [shape: f32[2,8,8], index: 4, kind: output, shape index: {1}]  }
   0x1   :  { %11 = vsyncpa [#allocation7], 0 }
   0x2   :  { %12 = vsyncpa [#allocation5], 0 }
   0x3   :  { %13 = vsyncpa [#allocation11], 0  ;;  %s630_s15 = smov [#allocation6]   ;;  %s631_s17 = smov [#allocation3]  }
   0x4   :  { %s31_s16 = sshll.u32 %s630_s15, 4  ;;  %s19_s18 = sshll.u32 %s631_s17, 4  ;;  %s32_s16 = int_to_ptr.vmem [resolvable:$true] %s31_s16  ;;  %s664_s18 = int_to_ptr.vmem [resolvable:$true] %s19_s18 }
   0x5   :  { %s512_s21 = scalar_lea.hbm %s769_s1, 256 }
   0x6   :  { %p513_p0 = scmp.ne.s32.totalorder %s769_s1, %s512_s21  ;;  %p516_p1 = scmp.lt.u32.totalorder %s512_s21, %s769_s1 }
   0x8   :  { %p518_p2 = pnand %p516_p1, %p513_p0 }
   0xa   :  { %521 = shalt.err (!%p518_p2)
}
   0xb   :  { %s522_s26 = scalar_lea.vmem %s32_s16, 256  ;;  %p527_p4 = scmp.lt.s32.totalorder %s32_s16, %s32_s16 }
   0xc   :  { %p523_p3 = scmp.ne.s32.totalorder %s32_s16, %s522_s26  ;;  %p528_p5 = scmp.lt.s32.totalorder %s522_s26, %s522_s26 }
   0xe   :  { %p529_p6 = por %p528_p5, %p527_p4 }
  0x10   :  { %p530_p7 = pnand %p529_p6, %p523_p3 }
  0x12   :  { %533 = shalt.err (!%p530_p7)
}
  0x13   :  { %s632_s27 = smov 128   ;;  %s633_s28 = smov 8  }
  0x14   :  { %37 = dma.hbm_to_vmem [thread:$0]  %s769_s1, 256, %s32_s16, [#allocation7], %s632_s27, %s632_s27, %s633_s28  }
  0x15   :  { %s534_s7 = scalar_lea.hbm %s768_s0, 256 }
  0x16   :  { %p535_p8 = scmp.ne.s32.totalorder %s768_s0, %s534_s7  ;;  %p538_p9 = scmp.lt.u32.totalorder %s534_s7, %s768_s0 }
  0x18   :  { %p540_p10 = pnand %p538_p9, %p535_p8 }
  0x1a   :  { %543 = shalt.err (!%p540_p10)
}
  0x1b   :  { %s544_s12 = scalar_lea.vmem %s664_s18, 256  ;;  %p549_p12 = scmp.lt.s32.totalorder %s664_s18, %s664_s18 }
  0x1c   :  { %p545_p11 = scmp.ne.s32.totalorder %s664_s18, %s544_s12  ;;  %p550_p13 = scmp.lt.s32.totalorder %s544_s12, %s544_s12 }
  0x1e   :  { %p551_p0 = por %p550_p13, %p549_p12 }
  0x20   :  { %p552_p1 = pnand %p551_p0, %p545_p11 }
  0x22   :  { %555 = shalt.err (!%p552_p1)
}
  0x23   :  { %25 = dma.hbm_to_vmem [thread:$0]  %s768_s0, 256, %s664_s18, [#allocation4], %s632_s27, %s632_s27, %s633_s28  }
  0x24   :  { %s634_s14 = smov [#allocation8]   ;;  %s556_s19 = scalar_lea.hbm %s770_s2, 256 }
  0x25   :  { %s43_s15 = sshll.u32 %s634_s14, 4  ;;  %p557_p2 = scmp.ne.s32.totalorder %s770_s2, %s556_s19  ;;  %s44_s15 = int_to_ptr.vmem [resolvable:$true] %s43_s15 }
  0x26   :  { %p560_p3 = scmp.lt.u32.totalorder %s556_s19, %s770_s2 }
  0x28   :  { %p562_p4 = pnand %p560_p3, %p557_p2 }
  0x2a   :  { %565 = shalt.err (!%p562_p4)
}
  0x2b   :  { %s566_s24 = scalar_lea.vmem %s44_s15, 256  ;;  %p571_p6 = scmp.lt.s32.totalorder %s44_s15, %s44_s15 }
  0x2c   :  { %p567_p5 = scmp.ne.s32.totalorder %s44_s15, %s566_s24  ;;  %p572_p7 = scmp.lt.s32.totalorder %s566_s24, %s566_s24 }
  0x2e   :  { %p573_p8 = por %p572_p7, %p571_p6 }
  0x30   :  { %p574_p9 = pnand %p573_p8, %p567_p5 }
  0x32   :  { %577 = shalt.err (!%p574_p9)
}
  0x33   :  { %49 = dma.hbm_to_vmem [thread:$0]  %s770_s2, 256, %s44_s15, [#allocation7], %s632_s27, %s632_s27, %s633_s28  }
  0x34   :  { %622 = dma.done.wait [#allocation4], 256  }
  0x35   :  { %623 = vsyncadd [#allocation4], 4294967040 }
  0x36   :  { %624 = dma.done.wait [#allocation7], 512  }
  0x37   :  { %625 = vsyncadd [#allocation7], 4294966784  ;;  %vm63_vm0 = vcmask 261120   ;;  %v635_v0 = vmov 0.0   ;;  %vm636_vm1 = vmmov 0   ;;  %v70_v1 = vld [vmem:[#allocation6] sm:$0xff] }
  0x38   :  { %475 = vmatprep.subr.mxu0 %v635_v0  ;;  %480 = vmatprep.subr.mxu1 %v635_v0  ;;  %64 = vst.msk [vmem:[#allocation2] sm:$0xff] %vm63_vm0, %v635_v0  ;;  %65 = vst.msk [vmem:[#allocation2 + $0x8] sm:$0xff] %vm63_vm0, %v635_v0  ;;  %v71_v2 = vld [vmem:[#allocation6 + $0x8] sm:$0xff]  ;;  %v66_v3 = vld [vmem:[#allocation3] sm:$0xff]  ;;  %vm227_vm2 = vcmask 64512   ;;  %s637_s2 = smov [#allocation10]  }
  0x39   :  { %477 = vmatprep.mubr.msk.f32.mxu0 %vm636_vm1, %v635_v0  ;;  %482 = vmatprep.mubr.msk.f32.mxu1 %vm636_vm1, %v635_v0  ;;  %v68_v4 = vmul.f32 0.17677669, %v66_v3  ;;  %v67_v5 = vld [vmem:[#allocation3 + $0x8] sm:$0xff]  ;;  %v72_v7 = vld [vmem:[#allocation8] sm:$0xff]  ;;  %s444_s25 = sshll.u32 %s637_s2, 4  ;;  %s445_s25 = int_to_ptr.vmem [resolvable:$true] %s444_s25 }
  0x3a   :  { %476 = vmatpush3.xpose.msk.msra.mxu0 %vm63_vm0, %v70_v1  ;;  %481 = vmatpush3.xpose.msk.msra.mxu1 %vm63_vm0, %v71_v2  ;;  %v69_v6 = vmul.f32 0.17677669, %v67_v5  ;;  %v73_v8 = vld [vmem:[#allocation8 + $0x8] sm:$0xff]  ;;  %s578_s26 = scalar_lea.vmem %s445_s25, 256  ;;  %p583_p11 = scmp.lt.s32.totalorder %s445_s25, %s445_s25 }
  0x3b   :  { %485 = vmatprep.subr.mxu0 %v635_v0  ;;  %490 = vmatprep.subr.mxu1 %v635_v0  ;;  %p579_p10 = scmp.ne.s32.totalorder %s445_s25, %s578_s26  ;;  %p584_p12 = scmp.lt.s32.totalorder %s578_s26, %s578_s26 }
  0x3d   :  { %478 = vmatmul.mubr.msk.f32.vlgmr.msra.gmra.mrb[0].mxu0 %vm63_vm0, %v68_v4  ;;  %483 = vmatmul.mubr.msk.f32.vlgmr.msra.gmra.mrb[0].mxu1 %vm63_vm0, %v69_v6  ;;  %p585_p13 = por %p584_p12, %p583_p11 }
  0x3e   :  { %487 = vmatprep.mubr.msk.f32.mxu0 %vm636_vm1, %v635_v0  ;;  %492 = vmatprep.mubr.msk.f32.mxu1 %vm636_vm1, %v635_v0 }
  0x3f   :  { %486 = vmatpush3.msra.mxu0 %v72_v7  ;;  %491 = vmatpush3.msra.mxu1 %v73_v8  ;;  %p586_p0 = pnand %p585_p13, %p579_p10 }
 0x110   :  { %v147_v9 = vpop.f32.mrb[0].mxu0  ;;  %v223_v10 = vpop.f32.mrb[0].mxu1 }
 0x111   :  { %v228_v11 = vsel %vm227_vm2, %v147_v9, -inf  ;;  %v235_v12 = vsel %vm227_vm2, %v223_v10, -inf  ;;  %v479_v13 = vpop.f32.mrb[1].mxu0  ;;  %v484_v14 = vpop.f32.mrb[1].mxu1 }
 0x112   :  { %v229_v15 = vrot.slane %v228_v11, 4  ;;  %v236_v16 = vrot.slane %v235_v12, 4 }
 0x114   :  { %v230_v17 = vmax.f32 %v228_v11, %v229_v15  ;;  %v237_v18 = vmax.f32 %v235_v12, %v236_v16 }
 0x116   :  { %v231_v19 = vrot.slane %v230_v17, 2  ;;  %v238_v20 = vrot.slane %v237_v18, 2 }
 0x118   :  { %v232_v21 = vmax.f32 %v230_v17, %v231_v19  ;;  %v239_v22 = vmax.f32 %v237_v18, %v238_v20 }
 0x11a   :  { %v233_v23 = vrot.slane %v232_v21, 1  ;;  %v240_v24 = vrot.slane %v239_v22, 1 }
 0x11c   :  { %v234_v25 = vmax.f32 %v232_v21, %v233_v23  ;;  %v241_v26 = vmax.f32 %v239_v22, %v240_v24 }
 0x11e   :  { %v242_v27 = vsub.f32 %v147_v9, %v234_v25  ;;  %v243_v28 = vsub.f32 %v223_v10, %v241_v26 }
 0x120   :  { %v244_v29 = vmul.f32 1.442695, %v242_v27  ;;  %v246_v30 = vmul.f32 1.442695, %v243_v28 }
 0x122   :  { %504 = vpow2.f32 %v244_v29 }
 0x123   :  { %506 = vpow2.f32 %v246_v30 }
 0x12c   :  { %v505_v31 = vpop.eup %504 }
 0x12d   :  { %v507_v32 = vpop.eup %506  ;;  %v248_v33 = vsel %vm227_vm2, %v505_v31, 0.0 }
 0x12e   :  { %v249_v34 = vrot.slane %v248_v33, 4  ;;  %v255_v35 = vsel %vm227_vm2, %v507_v32, 0.0 }
 0x12f   :  { %v256_v36 = vrot.slane %v255_v35, 4 }
 0x130   :  { %v250_v37 = vadd.f32 %v249_v34, %v248_v33 }
 0x131   :  { %v257_v38 = vadd.f32 %v256_v36, %v255_v35 }
 0x132   :  { %v251_v39 = vrot.slane %v250_v37, 2 }
 0x133   :  { %v258_v40 = vrot.slane %v257_v38, 2 }
 0x134   :  { %v252_v41 = vadd.f32 %v251_v39, %v250_v37 }
 0x135   :  { %v259_v42 = vadd.f32 %v258_v40, %v257_v38 }
 0x136   :  { %v253_v43 = vrot.slane %v252_v41, 1 }
 0x137   :  { %v260_v44 = vrot.slane %v259_v42, 1 }
 0x138   :  { %v254_v45 = vadd.f32 %v253_v43, %v252_v41 }
 0x139   :  { %v261_v46 = vadd.f32 %v260_v44, %v259_v42 }
 0x13a   :  { %508 = vrcp.f32 %v254_v45 }
 0x13b   :  { %510 = vrcp.f32 %v261_v46 }
 0x144   :  { %v509_v47 = vpop.eup %508 }
 0x145   :  { %v511_v48 = vpop.eup %510  ;;  %v264_v49 = vmul.f32 %v509_v47, %v505_v31 }
 0x146   :  { %v265_v50 = vmul.f32 %v511_v48, %v507_v32 }
 0x147   :  { %488 = vmatmul.mubr.msk.f32.vlgmr.msra.gmra.mrb[2].mxu0 %vm227_vm2, %v264_v49  ;;  %266 = vst.msk [vmem:[#allocation10] sm:$0xff] %vm227_vm2, %v264_v49 }
 0x148   :  { %493 = vmatmul.mubr.msk.f32.vlgmr.msra.gmra.mrb[2].mxu1 %vm227_vm2, %v265_v50  ;;  %267 = vst.msk [vmem:[#allocation10 + $0x8] sm:$0xff] %vm227_vm2, %v265_v50 }
 0x149   :  { %589 = shalt.err (!%p586_p0)
}
 0x14a   :  { %s590_s5 = scalar_lea.hbm %s772_s4, 256 }
 0x14b   :  { %p591_p1 = scmp.ne.s32.totalorder %s772_s4, %s590_s5  ;;  %p594_p2 = scmp.lt.u32.totalorder %s590_s5, %s772_s4 }
 0x14d   :  { %p596_p3 = pnand %p594_p2, %p591_p1 }
 0x14f   :  { %599 = shalt.err (!%p596_p3)
}
 0x150   :  { %450 = dma.vmem_to_hbm [thread:$0]  %s445_s25, 256, %s772_s4, [#allocation11], %s632_s27, %s632_s27, %s633_s28   ;;  %v268_v51 = vld [vmem:[#allocation2] sm:$0xff]  ;;  %v269_v52 = vld [vmem:[#allocation2 + $0x8] sm:$0xff] }
 0x151   :  { %s638_s12 = smov [#allocation9]  }
 0x152   :  { %s432_s1 = sshll.u32 %s638_s12, 4  ;;  %s433_s1 = int_to_ptr.vmem [resolvable:$true] %s432_s1 }
 0x153   :  { %s600_s4 = scalar_lea.vmem %s433_s1, 256  ;;  %p605_p5 = scmp.lt.s32.totalorder %s433_s1, %s433_s1 }
 0x154   :  { %p601_p4 = scmp.ne.s32.totalorder %s433_s1, %s600_s4  ;;  %p606_p6 = scmp.lt.s32.totalorder %s600_s4, %s600_s4 }
 0x156   :  { %p607_p7 = por %p606_p6, %p605_p5 }
 0x158   :  { %p608_p8 = pnand %p607_p7, %p601_p4 }
 0x21a   :  { %v339_v53 = vpop.f32.mrb[2].mxu0 }
 0x21b   :  { %v416_v54 = vadd.f32 %v339_v53, %v268_v51  ;;  %v412_v55 = vpop.f32.mrb[2].mxu1  ;;  %v489_v56 = vpop.f32.mrb[3].mxu0 }
 0x21c   :  { %v417_v57 = vadd.f32 %v412_v55, %v269_v52  ;;  %v494_v58 = vpop.f32.mrb[3].mxu1 }
 0x21d   :  { %418 = vst.msk [vmem:[#allocation2] sm:$0xff] %vm63_vm0, %v416_v54 }
 0x21e   :  { %419 = vst.msk [vmem:[#allocation2 + $0x8] sm:$0xff] %vm63_vm0, %v417_v57 }
 0x224   :  { %v423_v59 = vld [vmem:[#allocation2] sm:$0xff] }
 0x225   :  { %v424_v60 = vld [vmem:[#allocation2 + $0x8] sm:$0xff]  ;;  %425 = vst.msk [vmem:[#allocation9] sm:$0xff] %vm63_vm0, %v423_v59 }
 0x226   :  { %426 = vst.msk [vmem:[#allocation9 + $0x8] sm:$0xff] %vm63_vm0, %v424_v60 }
 0x227   :  { %611 = shalt.err (!%p608_p8)
}
 0x228   :  { %s612_s15 = scalar_lea.hbm %s771_s3, 256 }
 0x229   :  { %p613_p9 = scmp.ne.s32.totalorder %s771_s3, %s612_s15  ;;  %p616_p10 = scmp.lt.u32.totalorder %s612_s15, %s771_s3 }
 0x22b   :  { %p618_p11 = pnand %p616_p10, %p613_p9 }
 0x22d   :  { %621 = shalt.err (!%p618_p11)
}
 0x22e   :  { %438 = dma.vmem_to_hbm [thread:$0]  %s433_s1, 256, %s771_s3, [#allocation5], %s632_s27, %s632_s27, %s633_s28  }
 0x22f   :  { %626 = dma.done.wait [#allocation5], 256  }
 0x230   :  { %627 = vsyncadd [#allocation5], 4294967040 }
 0x231   :  { %628 = dma.done.wait [#allocation11], 256  }
 0x232   :  { %629 = vsyncadd [#allocation11], 4294967040 }
 0x233   :  { %457 = vsyncpa [#allocation4], 1 }
 0x234   :  { %458 = vsyncpa [#allocation7], 1 }
 0x235   :  { %459 = vsyncpa [#allocation5], 1 }
 0x236   :  { %460 = vsyncpa [#allocation11], 1 }

</bundles_post_ra>
